<compile_context>
chip_gen: v7x
topology: tpu7x:2x2x1
jax: 0.10.0
libtpu: 0.0.40
codegen_flags: <defaults>
</compile_context>

<pallas_src>
import functools

import jax
import jax.numpy as jnp
from jax import lax
from jax.experimental import pallas as pl
from jax.experimental.pallas import tpu as pltpu

EPSILON = 1e-08


def _dice_kernel(x_ref, t_ref, out_ref, acc_ref, *, soft, apply_softmax,
                 smooth, hw):
    """One (K, THW) spatial tile of one batch sample per invocation."""
    h = pl.program_id(1)
    n_hw = pl.num_programs(1)

    # -- per-sample accumulator init (new sample starts at spatial tile 0) --
    @pl.when(h == 0)
    def _():
        acc_ref[0] = 0.0   # intersect
        acc_ref[1] = 0.0   # denominator

    x = x_ref[...].astype(jnp.float32)   # (K, THW) logits, cast in-kernel
    t = t_ref[...]                       # (1, THW) int32 labels
    K, thw = x.shape

    # channel softmax (class axis on sublanes)
    if apply_softmax:
        m = jnp.max(x, axis=0, keepdims=True)
        e = jnp.exp(x - m)
        s = jnp.sum(e, axis=0, keepdims=True)
        p = e * pl.reciprocal(s, approx=False)   # 1 recip/pixel instead of K divides
    else:
        p = x

    # one-hot(target) built in-register: onehot[k, j] = (target[j] == k).
    # NOTE: out-of-range labels produce an all-zero column (F.one_hot would raise).
    cls = lax.broadcasted_iota(jnp.int32, (K, thw), 0)
    onehot = (cls == t).astype(jnp.float32)

    # mask out padded lanes of a partial last tile (static no-op when HW % THW == 0)
    if hw % thw != 0:
        col = lax.broadcasted_iota(jnp.int32, (1, thw), 1) + h * thw
        valid = col < hw
        p = jnp.where(valid, p, 0.0)
        onehot = jnp.where(valid, onehot, 0.0)

    inter_t = jnp.sum(p * onehot)
    if soft:
        # soft dice: sum(p^2 + onehot^2); onehot^2 == onehot (0/1 values)
        denom_t = jnp.sum(p * p) + jnp.sum(onehot)
    else:
        # regular dice: sum(p + onehot)
        denom_t = jnp.sum(p) + jnp.sum(onehot)

    acc_ref[0] += inter_t
    acc_ref[1] += denom_t

    # -- finalize the per-sample loss at the last spatial tile --
    @pl.when(h == n_hw - 1)
    def _():
        inter = acc_ref[0]
        den = acc_ref[1]
        if soft:
            loss = 1.0 - 2.0 * (inter + EPSILON) / (den + EPSILON)
        else:
            loss = 1.0 - (2.0 * inter + smooth) / (den + smooth)
        # lane-dense per-sample output block; wrapper reads [b, 0, 0]
        out_ref[...] = jnp.full(out_ref.shape, loss, dtype=out_ref.dtype)


def _pick_hw_tile(K, HW):
    """Lane-dense spatial tile (~<=1 MiB f32 per (K, THW) block, multiple of 128)."""
    thw = (1 << 20) // (4 * max(K, 1))       # ~1 MiB worth of f32 per block
    thw = max(512, min(thw, 8192))
    thw = max(128, (thw // 128) * 128)
    if HW <= thw:
        return HW                            # single full-extent tile (always legal)
    return thw


def dice_loss_pallas(logits_nchw, target_nhw, *, variant="none",
                     apply_softmax=True, smooth=EPSILON, tile_hw=None):
    """logits_nchw: (N, K, H, W) float (f32/bf16); target_nhw: (N, H, W) int labels."""
    N, K, H, W = logits_nchw.shape
    HW = H * W

    # Keep the logits in their native dtype (no f32 materialization in HBM).
    x = logits_nchw.reshape(N, K, HW)
    # TODO(synk): labels could be streamed as int8 when K < 128 to shave a few
    # percent of HBM traffic; int32 kept here for robustness.
    t = target_nhw.reshape(N, 1, HW).astype(jnp.int32)

    thw = _pick_hw_tile(K, HW) if tile_hw is None else min(int(tile_hw), HW)
    n_hw = pl.cdiv(HW, thw)

    kernel = functools.partial(
        _dice_kernel,
        soft=(variant == "soft"),
        apply_softmax=apply_softmax,
        smooth=float(smooth),
        hw=HW,
    )

    out = pl.pallas_call(
        kernel,
        out_shape=jax.ShapeDtypeStruct((N, 8, 128), jnp.float32),
        grid=(N, n_hw),
        in_specs=[
            pl.BlockSpec((None, K, thw), lambda b, h: (b, 0, h)),   # logits tile
            pl.BlockSpec((None, 1, thw), lambda b, h: (b, 0, h)),   # label tile
        ],
        # per-sample output block -> no cross-core race with a parallel batch axis
        out_specs=pl.BlockSpec((None, 8, 128), lambda b, h: (b, 0, 0)),
        scratch_shapes=[pltpu.SMEM((2,), jnp.float32)],             # [intersect, denom]
        compiler_params=pltpu.CompilerParams(
            dimension_semantics=("parallel", "arbitrary"),          # batch || , HW reduce
            vmem_limit_bytes=32 * 1024 * 1024,
        ),
    )(x, t)

    return jnp.mean(out[:, 0, 0])


class DiceLoss:
    """JAX/Pallas port of the PyTorch DiceLoss module."""

    def __init__(self, apply_softmax=True, variant=None):
        self.apply_softmax = apply_softmax
        self.variant = str(variant).lower()

    def __call__(self, logits_nchw, target_nhw):
        if self.variant == "soft":
            return dice_loss_pallas(logits_nchw, target_nhw, variant="soft",
                                    apply_softmax=self.apply_softmax)
        elif self.variant == "none":
            return dice_loss_pallas(logits_nchw, target_nhw, variant="none",
                                    apply_softmax=self.apply_softmax)
        return None  # matches PyTorch module's implicit None for other variants


def _ref_loss(logits, target, variant, apply_softmax):
    """Pure-JAX reference mirroring the PyTorch semantics."""
    N, K, H, W = logits.shape
    onehot = jnp.transpose(jax.nn.one_hot(target, K, dtype=jnp.float32),
                           (0, 3, 1, 2))                       # (N,K,H,W)
    p = jax.nn.softmax(logits.astype(jnp.float32), axis=1) if apply_softmax \
        else logits.astype(jnp.float32)
    dims = (1, 2, 3)
    inter = jnp.sum(p * onehot, axis=dims)
    if variant == "soft":
        denom = jnp.sum(p * p + onehot * onehot, axis=dims)
        return jnp.mean(1.0 - 2.0 * (inter + EPSILON) / (denom + EPSILON))
    denom = jnp.sum(p + onehot, axis=dims)
    return jnp.mean(1.0 - (2.0 * inter + EPSILON) / (denom + EPSILON))


if __name__ == "__main__":
    key = jax.random.PRNGKey(0)
    ok = True

    # (N, K, H, W, dtype, tile_hw, apply_softmax)
    cases = [
        (2, 4, 16, 16, jnp.float32, None, True),    # single full-extent tile
        (2, 4, 16, 16, jnp.bfloat16, 128, True),    # bf16 passthrough, 2 even tiles
        (2, 5, 18, 18, jnp.float32, 128, True),     # partial last tile (mask path)
        (2, 4, 16, 16, jnp.float32, None, False),   # no-softmax path
    ]

    for (N, K, H, W, dt, tile, apply_sm) in cases:
        key, k_x, k_t = jax.random.split(key, 3)
        logits = jax.random.normal(k_x, (N, K, H, W), dtype=jnp.float32).astype(dt)
        target = jax.random.randint(k_t, (N, H, W), 0, K, dtype=jnp.int32)

        for variant in ("none", "soft"):
            out = jax.block_until_ready(
                dice_loss_pallas(logits, target, variant=variant,
                                 apply_softmax=apply_sm, tile_hw=tile))
            ref = jax.block_until_ready(
                _ref_loss(logits, target, variant, apply_sm))
            if not jnp.allclose(out, ref, atol=1e-4, rtol=1e-4):
                ok = False
                print(f"MISMATCH shape=({N},{K},{H},{W}) dtype={dt.__name__} "
                      f"tile={tile} softmax={apply_sm} variant={variant}: "
                      f"kernel={out} ref={ref}")

    # also exercise the class wrapper once
    loss_mod = DiceLoss(apply_softmax=True, variant="soft")
    _ = jax.block_until_ready(loss_mod(
        jax.random.normal(jax.random.PRNGKey(1), (2, 4, 16, 16), jnp.float32),
        jax.random.randint(jax.random.PRNGKey(2), (2, 16, 16), 0, 4, jnp.int32)))

    if ok:
        print("KERNEL_OK")
</pallas_src>

<mosaic_0001>
module attributes {stable_mosaic.version = 11 : i64} {
  func.func @_dice_kernel(%arg0: i32, %arg1: i32, %arg2: memref<1x4x256xf32, #tpu.memory_space<vmem>>, %arg3: memref<1x1x256xi32, #tpu.memory_space<vmem>>, %arg4: memref<1x8x128xf32, #tpu.memory_space<vmem>>, %arg5: memref<2xf32, #tpu.memory_space<smem>>) attributes {dimension_semantics = [#tpu.dimension_semantics<parallel>, #tpu.dimension_semantics<arbitrary>], iteration_bounds = array<i64: 2, 1>, scalar_prefetch = 0 : i64, scratch_operands = 1 : i64, tpu.core_type = #tpu.core_type<tc>, window_params = [{transform_indices = @transform_0, window_bounds = array<i64: 1, 4, 256>}, {transform_indices = @transform_1, window_bounds = array<i64: 1, 1, 256>}, {transform_indices = @transform_2, window_bounds = array<i64: 1, 8, 128>}]} {
    %c0_i32 = arith.constant 0 : i32
    %0 = arith.cmpi eq, %arg1, %c0_i32 : i32
    %1 = arith.extui %0 : i1 to i32
    %c0_i32_0 = arith.constant 0 : i32
    %2 = arith.cmpi ne, %1, %c0_i32_0 : i32
    scf.if %2 {
      %cst_15 = arith.constant 0.000000e+00 : f32
      %c0_16 = arith.constant 0 : index
      %45 = memref.load %arg5[%c0_16] : memref<2xf32, #tpu.memory_space<smem>>
      memref.store %cst_15, %arg5[%c0_16] : memref<2xf32, #tpu.memory_space<smem>>
      %cst_17 = arith.constant 0.000000e+00 : f32
      %c1_18 = arith.constant 1 : index
      %46 = memref.load %arg5[%c1_18] : memref<2xf32, #tpu.memory_space<smem>>
      memref.store %cst_17, %arg5[%c1_18] : memref<2xf32, #tpu.memory_space<smem>>
    } else {
    }
    %c0 = arith.constant 0 : index
    %c0_1 = arith.constant 0 : index
    %c0_2 = arith.constant 0 : index
    %3 = vector.load %arg2[%c0, %c0_1, %c0_2] : memref<1x4x256xf32, #tpu.memory_space<vmem>>, vector<1x4x256xf32>
    %4 = vector.shape_cast %3 : vector<1x4x256xf32> to vector<4x256xf32>
    %c0_3 = arith.constant 0 : index
    %c0_4 = arith.constant 0 : index
    %c0_5 = arith.constant 0 : index
    %5 = vector.load %arg3[%c0_3, %c0_4, %c0_5] : memref<1x1x256xi32, #tpu.memory_space<vmem>>, vector<1x1x256xi32>
    %6 = vector.shape_cast %5 : vector<1x1x256xi32> to vector<1x256xi32>
    %cst = arith.constant dense<0xFF800000> : vector<256xf32>
    %7 = vector.multi_reduction <maximumf>, %4, %cst [0] : vector<4x256xf32> to vector<256xf32>
    %8 = vector.shape_cast %7 : vector<256xf32> to vector<1x256xf32>
    %9 = vector.broadcast %8 : vector<1x256xf32> to vector<4x256xf32>
    %10 = arith.subf %4, %9 : vector<4x256xf32>
    %11 = math.exp %10 : vector<4x256xf32>
    %cst_6 = arith.constant dense<0.000000e+00> : vector<256xf32>
    %12 = vector.multi_reduction <add>, %11, %cst_6 [0] : vector<4x256xf32> to vector<256xf32>
    %13 = vector.shape_cast %12 : vector<256xf32> to vector<1x256xf32>
    %14 = tpu.reciprocal %13 : vector<1x256xf32> -> vector<1x256xf32>
    %15 = vector.broadcast %14 : vector<1x256xf32> to vector<4x256xf32>
    %16 = arith.mulf %11, %15 : vector<4x256xf32>
    %17 = tpu.iota {dimensions = array<i32: 0>} : vector<4x256xi32>
    %18 = vector.broadcast %6 : vector<1x256xi32> to vector<4x256xi32>
    %19 = arith.cmpi eq, %17, %18 : vector<4x256xi32>
    %20 = arith.extui %19 : vector<4x256xi1> to vector<4x256xi32>
    %21 = arith.sitofp %20 : vector<4x256xi32> to vector<4x256xf32>
    %22 = arith.mulf %16, %21 : vector<4x256xf32>
    %23 = vector.shape_cast %22 : vector<4x256xf32> to vector<1x4x256xf32>
    %cst_7 = arith.constant dense<0.000000e+00> : vector<1xf32>
    %24 = vector.multi_reduction <add>, %23, %cst_7 [1, 2] : vector<1x4x256xf32> to vector<1xf32>
    %25 = vector.shape_cast %24 : vector<1xf32> to vector<1x1x1xf32>
    %26 = vector.extract %25[0, 0, 0] : f32 from vector<1x1x1xf32>
    %27 = vector.shape_cast %16 : vector<4x256xf32> to vector<1x4x256xf32>
    %cst_8 = arith.constant dense<0.000000e+00> : vector<1xf32>
    %28 = vector.multi_reduction <add>, %27, %cst_8 [1, 2] : vector<1x4x256xf32> to vector<1xf32>
    %29 = vector.shape_cast %28 : vector<1xf32> to vector<1x1x1xf32>
    %30 = vector.extract %29[0, 0, 0] : f32 from vector<1x1x1xf32>
    %31 = vector.shape_cast %21 : vector<4x256xf32> to vector<1x4x256xf32>
    %cst_9 = arith.constant dense<0.000000e+00> : vector<1xf32>
    %32 = vector.multi_reduction <add>, %31, %cst_9 [1, 2] : vector<1x4x256xf32> to vector<1xf32>
    %33 = vector.shape_cast %32 : vector<1xf32> to vector<1x1x1xf32>
    %34 = vector.extract %33[0, 0, 0] : f32 from vector<1x1x1xf32>
    %35 = arith.addf %30, %34 : f32
    %c0_10 = arith.constant 0 : index
    %36 = memref.load %arg5[%c0_10] : memref<2xf32, #tpu.memory_space<smem>>
    %37 = arith.addf %36, %26 : f32
    %c0_11 = arith.constant 0 : index
    %38 = memref.load %arg5[%c0_11] : memref<2xf32, #tpu.memory_space<smem>>
    memref.store %37, %arg5[%c0_11] : memref<2xf32, #tpu.memory_space<smem>>
    %c1 = arith.constant 1 : index
    %39 = memref.load %arg5[%c1] : memref<2xf32, #tpu.memory_space<smem>>
    %40 = arith.addf %39, %35 : f32
    %c1_12 = arith.constant 1 : index
    %41 = memref.load %arg5[%c1_12] : memref<2xf32, #tpu.memory_space<smem>>
    memref.store %40, %arg5[%c1_12] : memref<2xf32, #tpu.memory_space<smem>>
    %c0_i32_13 = arith.constant 0 : i32
    %42 = arith.cmpi eq, %arg1, %c0_i32_13 : i32
    %43 = arith.extui %42 : i1 to i32
    %c0_i32_14 = arith.constant 0 : i32
    %44 = arith.cmpi ne, %43, %c0_i32_14 : i32
    scf.if %44 {
      %c0_15 = arith.constant 0 : index
      %45 = memref.load %arg5[%c0_15] : memref<2xf32, #tpu.memory_space<smem>>
      %c1_16 = arith.constant 1 : index
      %46 = memref.load %arg5[%c1_16] : memref<2xf32, #tpu.memory_space<smem>>
      %cst_17 = arith.constant 2.000000e+00 : f32
      %47 = arith.mulf %cst_17, %45 : f32
      %cst_18 = arith.constant 9.99999993E-9 : f32
      %48 = arith.addf %47, %cst_18 : f32
      %cst_19 = arith.constant 9.99999993E-9 : f32
      %49 = arith.addf %46, %cst_19 : f32
      %50 = arith.divf %48, %49 : f32
      %cst_20 = arith.constant 1.000000e+00 : f32
      %51 = arith.subf %cst_20, %50 : f32
      %52 = vector.broadcast %51 : f32 to vector<8x128xf32>
      %c0_21 = arith.constant 0 : index
      %c0_22 = arith.constant 0 : index
      %c0_23 = arith.constant 0 : index
      %53 = vector.load %arg4[%c0_21, %c0_22, %c0_23] : memref<1x8x128xf32, #tpu.memory_space<vmem>>, vector<1x8x128xf32>
      %54 = vector.shape_cast %53 : vector<1x8x128xf32> to vector<8x128xf32>
      %55 = vector.shape_cast %52 : vector<8x128xf32> to vector<1x8x128xf32>
      tpu.vector_store %arg4[%c0_21, %c0_22, %c0_23], %55 {strides = array<i32>} : memref<1x8x128xf32, #tpu.memory_space<vmem>>, vector<1x8x128xf32>,
    } else {
    }
    return
  }
  func.func @transform_0(%arg0: i32, %arg1: i32) -> (i32, i32, i32) {
    %c0_i32 = arith.constant 0 : i32
    %c0_i32_0 = arith.constant 0 : i32
    return %arg0, %c0_i32, %arg1 : i32, i32, i32
  }
  func.func @transform_1(%arg0: i32, %arg1: i32) -> (i32, i32, i32) {
    %c0_i32 = arith.constant 0 : i32
    %c0_i32_0 = arith.constant 0 : i32
    return %arg0, %c0_i32, %arg1 : i32, i32, i32
  }
  func.func @transform_2(%arg0: i32, %arg1: i32) -> (i32, i32, i32) {
    %c0_i32 = arith.constant 0 : i32
    %c0_i32_0 = arith.constant 0 : i32
    %c0_i32_1 = arith.constant 0 : i32
    return %arg0, %c0_i32, %c0_i32_0 : i32, i32, i32
  }
}

</mosaic_0001>

<bundles_post_ra>
// kernel: tpu_custom_call.1
= control target key start
LH: loop header
LB: loop body
LE: loop exit
PB: predicated region body
PF: predicated region fallthrough
CT: control target
= control target key end

     0   :  { %7 = vsyncpa [#allocation4], 0  ;;  %s992_s0 = inlined_call_operand.hbm [shape: f32[2,4,256], index: 0, kind: input, shape index: {}]   ;;  %s993_s1 = inlined_call_operand.hbm [shape: s32[2,1,256], index: 1, kind: input, shape index: {}]   ;;  %s994_s2 = inlined_call_operand.hbm [shape: f32[2,8,128], index: 2, kind: output, shape index: {}]  }
   0x1   :  { %9 = vsyncpa [#allocation4 + $0x1], 0 }
   0x2   :  { %10 = vsyncpa [#allocation7], 0 }
   0x3   :  { %12 = vsyncpa [#allocation7 + $0x1], 0 }
   0x4   :  { %13 = vsyncpa [#allocation5], 0 }
   0x5   :  { %15 = vsyncpa [#allocation5 + $0x1], 0  ;;  %s763_s9 = smov 0   ;;  %s765_s10 = smov 0  }
   0x6   :  { %s767_s11 = smov 0   ;;  %s769_s12 = smov 0  }
   0x7   :  { %s771_s13 = smov 0   ;;  %s773_s14 = smov 0  }
   0x8 LB: > { %s487_s15 = sadd.s32 4294967295, %s742_s14   ;;  %s488_s16 = sadd.s32 4294967294, %s742_s14   ;;  %s742_s14 = sphi %s773_s14, %s21_s14   ;;  %s738_s13 = sphi %s771_s13, %s1014_s13   ;;  %s734_s12 = sphi %s769_s12, %s1013_s12   ;;  %s730_s11 = sphi %s767_s11, %s1012_s11   ;;  %s726_s10 = sphi %s765_s10, %s1011_s10   ;;  %s722_s9 = sphi %s763_s9, %s1010_s9  }
   0x9   : > { %s33_s17 = sadd.s32 1, %s738_s13  ;;  %s42_s18 = sadd.s32 1, %s730_s11 }
   0xa   : > { %p35_p0 = scmp.ge.s32.totalorder %s33_s17, 2  ;;  %p49_p1 = scmp.ne.s32.totalorder %s730_s11, %s726_s10 }
   0xb   : > { %p50_p2 = scmp.eq.s32.totalorder %s742_s14, 0  ;;  %p55_p3 = scmp.ne.s32.totalorder %s726_s10, %s722_s9 }
   0xc   : > { %s1016_s17 = smov (%p35_p0, %s33_s17), 0  ;;  %p56_p5 = scmp.eq.s32.totalorder %s487_s15, 0 }
   0xd   : > { %p804_p4 = por %p50_p2, %p49_p1  ;;  %s37_s20 = ssub.s32 %s738_s13, %s1016_s17 }
   0xe   : > { %p107_p6 = scmp.eq.s32.totalorder %s487_s15, 1  ;;  %p40_p7 = scmp.eq.s32.totalorder %s37_s20, 0 }
   0xf   : > { %p810_p8 = por %p56_p5, %p55_p3  ;;  %p113_p10 = scmp.eq.s32.totalorder %s488_s16, 1 }
  0x10   : > { %p814_p9 = por %p107_p6, %p49_p1  ;;  %p536_p13 = scmp.lt.s32.totalorder %s742_s14, 2 }
  0x11   : > { %s998_s21 = scalar_select %p810_p8, 1, 0 }
  0x12   : > { %s999_s22 = scalar_select %p814_p9, 1, 0 }
  0x13   : > { %s819_s23 = scalar_select %p40_p7, %s730_s11, %s42_s18  }
  0x14   : > { %p821_p11 = por %p113_p10, %p55_p3  ;;  %s828_s25 = sand.u32 1, %s730_s11  }
  0x15   : > { %s491_s26 = sshll.u32 %s828_s25, 3  ;;  %s509_s27 = sshll.u32 %s738_s13, 7 }
  0x16   : > { %s1000_s24 = scalar_select %p821_p11, 1, 0 }
  0x17   : > { %s835_s30 = scalar_lea.hbm %s992_s0, %s509_s27  ;;  %s137_s3 = scalar_lea.vmem [#allocation3], %s491_s26 }
  0x18   : > { %s147_s4 = sshll.u32 %s137_s3, 4  ;;  %p841_p0 = pnand %p536_p13, %p804_p4  ;;  %s837_s4 = int_to_ptr.vmem [resolvable:$true] %s147_s4 }
  0x19   : > { %s134_s6 = scalar_lea.sflag [#allocation4], %s828_s25  ;;  %s596_s7 = scalar_lea.hbm %s835_s30, 128 }
  0x1a   : > { %p597_p3 = scmp.ne.s32.totalorder %s835_s30, %s596_s7  ;;  %p598_p5 = pneg %p841_p0 }
  0x1b   : > { %s601_s16 = scalar_lea.hbm %s992_s0, 256  ;;  %p602_p4 = scmp.lt.u32.totalorder %s835_s30, %s992_s0 }
  0x1c   : > { %p599_p6 = pnand %p598_p5, %p597_p3  ;;  %p603_p10 = scmp.lt.u32.totalorder %s601_s16, %s596_s7 }
  0x1d   : > { %p605_p12 = scmp.lt.u32.totalorder %s596_s7, %s835_s30 }
  0x1e   : > { %p600_p7 = pneg %p599_p6  ;;  %p604_p13 = por %p603_p10, %p602_p4 }
  0x20   : > { %p606_p1 = por %p605_p12, %p604_p13 }
  0x22   : > { %p607_p2 = pnand %p606_p1, %p600_p7 }
  0x24   : > { %610 = shalt.err (!%p607_p2)
}
  0x25   : > { %s611_s20 = scalar_lea.vmem %s837_s4, 128  ;;  %s744_s26 = smov [#allocation3]  }
  0x26   : > { %p612_p3 = scmp.ne.s32.totalorder %s837_s4, %s611_s20  ;;  %s616_s27 = sshll.u32 %s744_s26, 4  ;;  %s617_s27 = int_to_ptr.vmem [resolvable:$false] %s616_s27 }
  0x27   : > { %s618_s28 = scalar_lea.vmem %s617_s27, 256  ;;  %p619_p9 = scmp.lt.s32.totalorder %s837_s4, %s617_s27 }
  0x28   : > { %p614_p6 = pnand %p612_p3, %p598_p5  ;;  %p620_p4 = scmp.lt.s32.totalorder %s618_s28, %s611_s20 }
  0x2a   : > { %p615_p11 = pneg %p614_p6  ;;  %p621_p10 = por %p620_p4, %p619_p9 }
  0x2c   : > { %p622_p12 = pnand %p621_p10, %p615_p11 }
  0x2e   : > { %625 = shalt.err (!%p622_p12)
}
  0x2f   : > { %528 = dma.hbm_to_vmem [thread:$0]  (!%p841_p0), %s835_s30, 128, %s837_s4, %s134_s6  }
  0x30   : > { %p1002_p1 = scmp.lt.s32.totalorder %s742_s14, 3  ;;  %p1003_p2 = scmp.ge.s32.totalorder %s742_s14, 1 }
  0x31   : > { %s494_s3 = sshll.u32 %s828_s25, 1  ;;  %s510_s7 = sshll.u32 %s738_s13, 5 }
  0x32   : > { %p877_p7 = pnand %p1003_p2, %p1002_p1  ;;  %s886_s16 = scalar_lea.hbm %s993_s1, %s510_s7 }
  0x33   : > { %s158_s18 = scalar_lea.vmem [#allocation6], %s494_s3  ;;  %s155_s30 = scalar_lea.sflag [#allocation7], %s828_s25 }
  0x34   : > { %s1004_s29 = scalar_select %p877_p7, 1, 0 }
  0x35   : > { %s168_s19 = sshll.u32 %s158_s18, 4  ;;  %s626_s4 = scalar_lea.hbm %s886_s16, 32  ;;  %s169_s19 = int_to_ptr.vmem [resolvable:$true] %s168_s19 }
  0x36   : > { %p627_p9 = scmp.ne.s32.totalorder %s886_s16, %s626_s4  ;;  %s631_s26 = scalar_lea.hbm %s993_s1, 64 }
  0x37   : > { %p632_p3 = scmp.lt.u32.totalorder %s886_s16, %s993_s1  ;;  %p633_p6 = scmp.lt.u32.totalorder %s631_s26, %s626_s4 }
  0x38   : > { %p629_p11 = pnand %p627_p9, %p598_p5  ;;  %p635_p10 = scmp.lt.u32.totalorder %s626_s4, %s886_s16 }
  0x39   : > { %p634_p4 = por %p633_p6, %p632_p3 }
  0x3a   : > { %p630_p13 = pneg %p629_p11 }
  0x3b   : > { %p636_p12 = por %p635_p10, %p634_p4 }
  0x3d   : > { %p637_p1 = pnand %p636_p12, %p630_p13 }
  0x3f   : > { %640 = shalt.err (!%p637_p1)
}
  0x40   : > { %s641_s25 = scalar_lea.vmem %s169_s19, 32  ;;  %s745_s3 = smov [#allocation6]  }
  0x41   : > { %p642_p2 = scmp.ne.s32.totalorder %s169_s19, %s641_s25  ;;  %s646_s7 = sshll.u32 %s745_s3, 4  ;;  %s647_s7 = int_to_ptr.vmem [resolvable:$false] %s646_s7 }
  0x42   : > { %s648_s8 = scalar_lea.vmem %s647_s7, 64  ;;  %p649_p8 = scmp.lt.s32.totalorder %s169_s19, %s647_s7 }
  0x43   : > { %p644_p9 = pnand %p642_p2, %p598_p5  ;;  %p650_p7 = scmp.lt.s32.totalorder %s648_s8, %s641_s25 }
  0x45   : > { %p645_p11 = pneg %p644_p9  ;;  %p651_p3 = por %p650_p7, %p649_p8 }
  0x47   : > { %p652_p6 = pnand %p651_p3, %p645_p11 }
  0x49   : > { %655 = shalt.err (!%p652_p6)
}
  0x4a   : > { %531 = dma.hbm_to_vmem [thread:$0]  (!%p841_p0), %s886_s16, 32, %s169_s19, %s155_s30  }
  0x4b   : > { %p1005_p13 = scmp.ne.s32.totalorder %s1004_s29, 0 }
  0x4c   : > { %s911_s15 = sand.u32 (!%p1005_p13), 1, %s726_s10   ;;  %p1006_p8 = scmp.ne.s32.totalorder (!%p1005_p13), %s998_s21, 0 }
  0x4d   : > { %177 = sbr.rel (%p1005_p13) target bundleno = 452 (0x1c4), region = 28  ;;  %s498_s18 = sshll.u32 (!%p1005_p13), %s911_s15, 3 }
  0x4e   : > { %s180_s4 = scalar_lea.sflag (!%p1005_p13), [#allocation4], %s911_s15  ;;  %s183_s6 = scalar_lea.vmem (!%p1005_p13), [#allocation3], %s498_s18 }
  0x54   : > { %709 = dma.done.wait (%p1006_p8), %s180_s4, 128  }
  0x55   : > { %711 = vsyncadd (%p1006_p8), %s180_s4, 4294967168  ;;  %s499_s5 = sshll.u32 %s911_s15, 1  ;;  %s189_s29 = scalar_lea.sflag [#allocation7], %s911_s15 }
  0x56   : > { %s192_s16 = scalar_lea.vmem [#allocation6], %s499_s5 }
  0x57   : > { %713 = dma.done.wait (%p1006_p8), %s189_s29, 32  }
  0x58   : > { %715 = vsyncadd (%p1006_p8), %s189_s29, 4294967264  ;;  %v279_v0 = vlaneseq  ;;  %vm233_vm0 = vcmask 1043456   ;;  %v228_v4 = vld [vmem:[%s183_s6] sm:$0xff]  ;;  %v229_v5 = vld [vmem:[%s192_s16] sm:$0x3]  ;;  %v746_v12 = vmov 0.0  }
  0x59   : > { %v231_v6 = vcombine.high %v228_v4, %v228_v4  ;;  %v234_v9 = vsel %vm233_vm0, %v228_v4, -inf  ;;  %s506_s3 = sshll.u32 %s734_s12, 7  ;;  %s217_s8 = scalar_lea.vmem [#allocation8], %s498_s18 }
  0x5a   : > { %v280_v1 = vshrl.u32 %v279_v0, 7  ;;  %v235_v10 = vrot.slane %v234_v9, 4  ;;  %s380_s4 = sshll.u32 %s217_s8, 4  ;;  %s943_s16 = scalar_lea.hbm %s994_s2, %s506_s3  ;;  %s945_s4 = int_to_ptr.vmem [resolvable:$true] %s380_s4 }
  0x5b   : > { %v241_v11 = vsel %vm233_vm0, %v231_v6, -inf  ;;  %p1007_p5 = scmp.ne.s32.totalorder %s999_s22, 0  ;;  %s747_s12 = smov [#allocation8]  }
  0x5c   : > { %v283_v2 = vsub.s32 0, %v280_v1  ;;  %v287_v3 = vsub.s32 1, %v280_v1  ;;  %v236_v15 = vmax.f32 %v234_v9, %v235_v10  ;;  %v242_v16 = vrot.slane %v241_v11, 4  ;;  %s660_s18 = sshll.u32 %s747_s12, 4  ;;  %s661_s18 = int_to_ptr.vmem [resolvable:$false] %s660_s18 }
  0x5d   : > { %p663_p10 = scmp.lt.s32.totalorder %s945_s4, %s661_s18 }
  0x5e   : > { %v284_v7 = vrot.slane %v229_v5, %v283_v2  ;;  %v288_v8 = vrot.slane %v229_v5, %v287_v3  ;;  %v237_v20 = vrot.slane %v236_v15, 2  ;;  %v243_v21 = vmax.f32 %v241_v11, %v242_v16 }
  0x60   : > { %vm289_vm1 = vcmp.eq.s32.totalorder %v280_v1, %v284_v7  ;;  %vm290_vm2 = vcmp.eq.s32.totalorder %v280_v1, %v288_v8  ;;  %v238_v22 = vmax.f32 %v236_v15, %v237_v20  ;;  %v244_v23 = vrot.slane %v243_v21, 2 }
  0x61   : > { %v501_v13 = vsel %vm289_vm1, 1.0, %v746_v12  ;;  %v502_v14 = vsel %vm290_vm2, 1.0, %v746_v12 }
  0x62   : > { %v330_v17 = vsel %vm233_vm0, %v501_v13, 0.0  ;;  %v331_v18 = vsel %vm233_vm0, %v502_v14, 0.0  ;;  %v239_v24 = vrot.slane %v238_v22, 1  ;;  %v245_v25 = vmax.f32 %v243_v21, %v244_v23 }
  0x63   : > { %v332_v19 = vadd.f32 %v331_v18, %v330_v17  ;;  %v297_v50 = vcombine.low %v501_v13, %v502_v14 }
  0x64   : > { %v240_v26 = vmax.f32 %v238_v22, %v239_v24  ;;  %v246_v27 = vrot.slane %v245_v25, 1 }
  0x65   : > { %333 = vadd.xlane.f32.xlu1 %v332_v19 }
  0x66   : > { %v247_v28 = vmax.f32 %v245_v25, %v246_v27 }
  0x68   : > { %v250_v29 = vcombine.low %v240_v26, %v247_v28 }
  0x6a   : > { %v252_v30 = vsub.f32 %v228_v4, %v250_v29 }
  0x6c   : > { %v253_v31 = vmul.f32 1.442695, %v252_v30 }
  0x6e   : > { %588 = vpow2.f32 %v253_v31 }
  0x78   : > { %v589_v32 = vpop.eup %588 }
  0x79   : > { %v256_v33 = vcombine.high %v589_v32, %v589_v32  ;;  %v258_v34 = vsel %vm233_vm0, %v589_v32, 0.0 }
  0x7a   : > { %v259_v35 = vrot.slane %v258_v34, 4 }
  0x7b   : > { %v265_v36 = vsel %vm233_vm0, %v256_v33, 0.0 }
  0x7c   : > { %v260_v37 = vadd.f32 %v259_v35, %v258_v34  ;;  %v266_v38 = vrot.slane %v265_v36, 4 }
  0x7e   : > { %v261_v39 = vrot.slane %v260_v37, 2  ;;  %v267_v40 = vadd.f32 %v266_v38, %v265_v36 }
  0x80   : > { %v262_v41 = vadd.f32 %v261_v39, %v260_v37  ;;  %v268_v42 = vrot.slane %v267_v40, 2 }
  0x82   : > { %v263_v43 = vrot.slane %v262_v41, 1  ;;  %v269_v44 = vadd.f32 %v268_v42, %v267_v40 }
  0x84   : > { %v264_v45 = vadd.f32 %v263_v43, %v262_v41  ;;  %v270_v46 = vrot.slane %v269_v44, 1 }
  0x86   : > { %v271_v47 = vadd.f32 %v270_v46, %v269_v44  ;;  %590 = vrcp.f32 %v264_v45 }
  0x88   : > { %592 = vrcp.f32 %v271_v47 }
  0x90   : > { %v591_v48 = vpop.eup %590 }
  0x92   : > { %v593_v49 = vpop.eup %592 }
  0x93   : > { %v276_v51 = vcombine.low %v591_v48, %v593_v49 }
  0x95   : > { %v278_v52 = vmul.f32 %v589_v32, %v276_v51 }
  0x97   : > { %v299_v53 = vmul.f32 %v297_v50, %v278_v52  ;;  %v316_v54 = vcombine.high %v278_v52, %v278_v52  ;;  %v318_v58 = vsel %vm233_vm0, %v278_v52, 0.0 }
  0x99   : > { %v301_v55 = vcombine.high %v299_v53, %v299_v53  ;;  %v303_v56 = vsel %vm233_vm0, %v299_v53, 0.0  ;;  %v319_v59 = vsel %vm233_vm0, %v316_v54, 0.0 }
  0x9a   : > { %v320_v61 = vadd.f32 %v319_v59, %v318_v58 }
  0x9b   : > { %v304_v57 = vsel %vm233_vm0, %v301_v55, 0.0 }
  0x9c   : > { %v305_v60 = vadd.f32 %v304_v57, %v303_v56 }
  0x9e   : > { %306 = vadd.xlane.f32.xlu0 %v305_v60 }
  0xa2   : > { %321 = vadd.xlane.f32.xlu0 %v320_v61 }
  0xf2   : > { %v334_v62 = vpop.xlane.xlu1 %333 }
  0xf3   : > { %v335_v63 = vrot.slane %v334_v62, 4 }
  0xf5   : > { %v336_v0 = vadd.f32 %v335_v63, %v334_v62 }
  0xf7   : > { %v337_v4 = vrot.slane %v336_v0, 2 }
  0xf9   : > { %v338_v10 = vadd.f32 %v337_v4, %v336_v0 }
  0xfb   : > { %v339_v15 = vrot.slane %v338_v10, 1 }
  0xfd   : > { %v340_v18 = vadd.f32 %v339_v15, %v338_v10 }
 0x12b   : > { %v307_v1 = vpop.xlane.xlu0 %306 }
 0x12c   : > { %v308_v2 = vrot.slane %v307_v1, 4 }
 0x12e   : > { %v309_v3 = vadd.f32 %v308_v2, %v307_v1 }
 0x12f   : > { %v322_v5 = vpop.xlane.xlu0 %321 }
 0x130   : > { %v310_v6 = vrot.slane %v309_v3, 2  ;;  %v323_v7 = vrot.slane %v322_v5, 4 }
 0x132   : > { %v324_v8 = vadd.f32 %v323_v7, %v322_v5  ;;  %v311_v9 = vadd.f32 %v310_v6, %v309_v3 }
 0x134   : > { %v325_v11 = vrot.slane %v324_v8, 2  ;;  %v312_v12 = vrot.slane %v311_v9, 1 }
 0x136   : > { %v326_v13 = vadd.f32 %v325_v11, %v324_v8  ;;  %v313_v14 = vadd.f32 %v312_v12, %v311_v9 }
 0x138   : > { %511 = vpush %v313_v14  ;;  %v327_v16 = vrot.slane %v326_v13, 1 }
 0x13a   : > { %v328_v17 = vadd.f32 %v327_v16, %v326_v13 }
 0x13c   : > { %513 = vpush %v328_v17 }
 0x13d   : > { %515 = vpush %v340_v18 }
 0x169   : > { %s512_s21 = spop %511 }
 0x16a   : > { %s356_s27 = smul.f32 2.0, %s512_s21  ;;  %s367_s21 = scalar_lea.sflag [#allocation5], %s911_s15 }
 0x16c   : > { %s357_s28 = sadd.f32 1e-08, %s356_s27 }
 0x16d   : > { %s514_s19 = spop %513 }
 0x16e   : > { %s516_s30 = spop %515 }
 0x16f   : > { %s342_s20 = sadd.f32 %s516_s30, %s514_s19  ;;  %s656_s19 = scalar_lea.vmem %s945_s4, 128 }
 0x170   : > { %p657_p0 = scmp.ne.s32.totalorder %s945_s4, %s656_s19  ;;  %s662_s30 = scalar_lea.vmem %s661_s18, 256 }
 0x171   : > { %s358_s26 = sadd.f32 1e-08, %s342_s20  ;;  %p664_p12 = scmp.lt.s32.totalorder %s662_s30, %s656_s19 }
 0x172   : > { %p658_p7 = pnand %p657_p0, %p1007_p5 }
 0x173   : > { %v359_v19 = vstv %s358_s26  ;;  %p665_p1 = por %p664_p12, %p663_p10 }
 0x174   : > { %594 = vrcp.f32 %v359_v19  ;;  %p659_p4 = pneg %p658_p7 }
 0x176   : > { %p666_p2 = pnand %p665_p1, %p659_p4 }
 0x17e   : > { %v595_v20 = vpop.eup %594 }
 0x17f   : > { %517 = vpush %v595_v20 }
 0x1b0   : > { %s518_s25 = spop %517 }
 0x1b1   : > { %s362_s7 = smul.f32 %s518_s25, %s357_s28 }
 0x1b3   : > { %s363_s6 = ssub.f32 1.0, %s362_s7 }
 0x1b5   : > { %v364_v21 = vstv %s363_s6 }
 0x1b6   : > { %365 = vst [vmem:[%s217_s8] sm:$0xff] %v364_v21 }
 0x1b7   : > { %669 = shalt.err (!%p666_p2)
}
 0x1b8   : > { %s670_s15 = scalar_lea.hbm %s943_s16, 128  ;;  %s674_s27 = scalar_lea.hbm %s994_s2, 256 }
 0x1b9   : > { %p671_p9 = scmp.ne.s32.totalorder %s943_s16, %s670_s15  ;;  %p675_p6 = scmp.lt.u32.totalorder %s943_s16, %s994_s2 }
 0x1ba   : > { %p676_p13 = scmp.lt.u32.totalorder %s674_s27, %s670_s15  ;;  %p678_p0 = scmp.lt.u32.totalorder %s670_s15, %s943_s16 }
 0x1bb   : > { %p672_p11 = pnand %p671_p9, %p1007_p5 }
 0x1bc   : > { %p677_p8 = por %p676_p13, %p675_p6 }
 0x1bd   : > { %p673_p3 = pneg %p672_p11 }
 0x1be   : > { %p679_p7 = por %p678_p0, %p677_p8 }
 0x1c0   : > { %p680_p4 = pnand %p679_p7, %p673_p3 }
 0x1c2   : > { %683 = shalt.err (!%p680_p4)
}
 0x1c3   : > { %523 = dma.vmem_to_hbm [thread:$0]  (%p1007_p5), %s945_s4, 128, %s943_s16, %s367_s21  }
 0x1c4 PF: > { %s392_s3 = sand.u32 1, %s722_s9   ;;  %p1008_p10 = scmp.ne.s32.totalorder %s1000_s24, 0 }
 0x1c5   : > { %p1009_p12 = scmp.ge.s32.totalorder %s742_s14, 2  ;;  %s393_s7 = scalar_lea.sflag [#allocation5], %s392_s3 }
 0x1c7   : > { %p533_p1 = pnand %p1009_p12, %p1008_p10 }
 0x1c9   : > { %717 = dma.done.wait (!%p533_p1), %s393_s7, 128  }
 0x1ca   : > { %719 = vsyncadd (!%p533_p1), %s393_s7, 4294967168  ;;  %s21_s14 = sadd.s32 1, %s742_s14   ;;  %s1010_s9 = smov %s726_s10 }
 0x1cb   : > { %p18_p2 = scmp.ge.s32.totalorder %s21_s14, 4   ;;  %s1011_s10 = smov %s730_s11 }
 0x1cc   : > { %s1012_s11 = smov %s819_s23  ;;  %s1013_s12 = smov %s738_s13 }
 0x1cd   : > { %s1014_s13 = smov %s1016_s17  ;;  %20 = sbr.rel (!%p18_p2) target bundleno = 8 (0x8), region = 98 }
 0x1d4   :  { %398 = vsyncpa [#allocation4], 1 }
 0x1d5   :  { %400 = vsyncpa [#allocation4 + $0x1], 1 }
 0x1d6   :  { %401 = vsyncpa [#allocation7], 1 }
 0x1d7   :  { %403 = vsyncpa [#allocation7 + $0x1], 1 }
 0x1d8   :  { %404 = vsyncpa [#allocation5], 1 }
 0x1d9   :  { %406 = vsyncpa [#allocation5 + $0x1], 1 }

</bundles_post_ra>
